<compile_context>
chip_gen: v7x
topology: tpu7x:2x2x1
jax: 0.10.0
libtpu: 0.0.40
codegen_flags: <defaults>
</compile_context>

<pallas_src>
import jax
import jax.numpy as jnp
from jax.experimental import pallas as pl
from jax.experimental.pallas import tpu as pltpu

_LANE = 128
_NEG_BIG = -1e30


def _categorical_kernel(x_ref, w_ref, b_ref, out_ref):
    # x_ref:   (block_b, D)     f32/bf16 activations
    # w_ref:   (D, n_pad)       bf16/f32 weight (transposed, zero-padded cols)
    # b_ref:   (1, n_pad)       f32 bias, padded cols pre-filled with -1e30
    # out_ref: (block_b, N)     f32 normalized logits (log-probabilities)
    x = x_ref[...].astype(w_ref.dtype)          # in-kernel cast (free under DMA)
    logits = jnp.dot(x, w_ref[...], preferred_element_type=jnp.float32) + b_ref[...]

    # Stable log-softmax in f32.  Padded columns are already -1e30 via the bias,
    # so no iota/where mask is needed; exp underflows to exactly 0 there.
    m = jnp.max(logits, axis=-1, keepdims=True)
    shifted = logits - m
    denom = jnp.sum(jnp.exp(shifted), axis=-1, keepdims=True)
    logprobs = shifted - jnp.log(denom)

    # Emit only the valid N class columns (unpadded output -> 8x fewer HBM bytes).
    out_ref[...] = logprobs[:, : out_ref.shape[-1]]


def prepare_categorical_params(w_t, b, *, use_bf16=True):
    """One-time parameter prep (call at init, reuse every forward step).

    Pads the class dim to a multiple of 128 lanes, pre-fills padded bias
    columns with -1e30 (acts as the logsumexp mask), and casts W to bf16 for
    the MXU.  Hoisting this out of the hot path removes per-call HBM passes
    over the weight.
    """
    D, N = w_t.shape
    n_pad = ((N + _LANE - 1) // _LANE) * _LANE
    w_dtype = jnp.bfloat16 if use_bf16 else jnp.float32
    w_p = jnp.zeros((D, n_pad), w_dtype).at[:, :N].set(w_t.astype(w_dtype))
    b_p = jnp.full((1, n_pad), _NEG_BIG, jnp.float32).at[:, :N].set(
        b.astype(jnp.float32))
    return w_p, b_p, N


def _choose_block_b(B, requested):
    """Batch tile: multiple of 8, never larger than B, >=2 grid steps for B>=16."""
    if B <= 8:
        return B                                  # block == full batch dim (legal)
    blk = min(requested, (B // 8) * 8)            # never exceed the array dim
    if B >= 16:
        half = ((B + 1) // 2 + 7) // 8 * 8        # ceil(B/2) rounded up to 8
        blk = min(blk, half)                      # >=2 steps -> both TCs on v7x
    return max(blk, 8)


def categorical_forward(x, w_p, b_p, num_outputs, *, block_b=1024):
    """Fused Linear + Categorical(logits=...) normalization.

    Args:
      x:            (B, num_inputs) activations (f32 or bf16).
      w_p, b_p:     outputs of prepare_categorical_params (lane-padded).
      num_outputs:  number of (valid) action classes N.
    Returns:
      (B, N) float32 normalized logits (log-probabilities) defining the
      Categorical distribution.
    """
    B, D = x.shape
    n_pad = w_p.shape[1]
    blk = _choose_block_b(B, block_b)
    grid = (pl.cdiv(B, blk),)

    # Explicit scoped-VMEM budget (v5e default is only 16 MiB). Capped at
    # 64 MiB so it is valid on every generation (v7x physical VMEM = 64 MiB).
    need = (2 * blk * D * x.dtype.itemsize          # x, double-buffered
            + 2 * D * n_pad * w_p.dtype.itemsize    # W, double-buffered
            + 2 * n_pad * 4                         # bias
            + 2 * blk * num_outputs * 4             # output, double-buffered
            + 6 * blk * n_pad * 4)                  # f32 temporaries headroom
    vmem_limit = int(min(max(need, 32 * 1024 * 1024), 64 * 1024 * 1024))

    return pl.pallas_call(
        _categorical_kernel,
        out_shape=jax.ShapeDtypeStruct((B, num_outputs), jnp.float32),
        grid_spec=pltpu.PrefetchScalarGridSpec(
            num_scalar_prefetch=0,
            grid=grid,
            in_specs=[
                pl.BlockSpec((blk, D), lambda i: (i, 0)),    # x row tile
                pl.BlockSpec((D, n_pad), lambda i: (0, 0)),  # W resident
                pl.BlockSpec((1, n_pad), lambda i: (0, 0)),  # b resident
            ],
            out_specs=pl.BlockSpec((blk, num_outputs), lambda i: (i, 0)),
        ),
        compiler_params=pltpu.CompilerParams(
            dimension_semantics=("parallel",),   # batch axis across TCs on v7x
            vmem_limit_bytes=vmem_limit,
        ),
    )(x, w_p, b_p)


def init_categorical_params(key, num_inputs, num_outputs, gain=0.01):
    """Orthogonal init (gain=0.01) for W, zeros for b (matches init_ in the module).

    PyTorch weight shape is (num_outputs, num_inputs); we return it transposed
    as (num_inputs, num_outputs) for the x @ W kernel layout.
    """
    a = jax.random.normal(key, (num_outputs, num_inputs), dtype=jnp.float32)
    if num_outputs <= num_inputs:
        q, r = jnp.linalg.qr(a.T)              # q: (num_inputs, num_outputs)
        d = jnp.diag(r)
        q = q * jnp.where(d >= 0, 1.0, -1.0)[None, :]
        w = q.T                                 # (num_outputs, num_inputs)
    else:
        q, r = jnp.linalg.qr(a)
        d = jnp.diag(r)
        q = q * jnp.where(d >= 0, 1.0, -1.0)[None, :]
        w = q
    w = gain * w
    b = jnp.zeros((num_outputs,), dtype=jnp.float32)
    return w.T.astype(jnp.float32), b           # (num_inputs, num_outputs), (num_outputs,)


if __name__ == "__main__":
    key = jax.random.PRNGKey(0)
    k_x, k_w = jax.random.split(key)

    batch = 8
    num_inputs = 32
    num_outputs = 16

    x = jax.random.normal(k_x, (batch, num_inputs), dtype=jnp.float32)
    w_t, b = init_categorical_params(k_w, num_inputs, num_outputs)

    # One-time param prep (hoisted out of the per-step forward).
    w_p, b_p, n_valid = prepare_categorical_params(w_t, b, use_bf16=True)

    logprobs = categorical_forward(x, w_p, b_p, n_valid)
    jax.block_until_ready(logprobs)

    # Reference: same bf16-rounded MXU operands, f32 accumulation + log-softmax.
    x_ref = x.astype(jnp.bfloat16).astype(jnp.float32)
    w_ref = w_t.astype(jnp.bfloat16).astype(jnp.float32)
    ref_raw = x_ref @ w_ref + b[None, :]
    ref_norm = ref_raw - jax.scipy.special.logsumexp(ref_raw, axis=-1, keepdims=True)

    assert logprobs.shape == (batch, num_outputs)
    assert jnp.allclose(logprobs, ref_norm, atol=1e-5, rtol=1e-5)
    # Normalized logits must be valid log-probs (rows sum to 1 in prob space).
    assert jnp.allclose(jnp.sum(jnp.exp(logprobs), axis=-1), 1.0, atol=1e-5)

    print("KERNEL_OK")
</pallas_src>

<mosaic_0001>
module attributes {stable_mosaic.version = 11 : i64} {
  func.func @_categorical_kernel(%arg0: i32, %arg1: memref<8x32xf32, #tpu.memory_space<vmem>>, %arg2: memref<32x128xbf16, #tpu.memory_space<vmem>>, %arg3: memref<1x128xf32, #tpu.memory_space<vmem>>, %arg4: memref<8x16xf32, #tpu.memory_space<vmem>>) attributes {dimension_semantics = [#tpu.dimension_semantics<parallel>], iteration_bounds = array<i64: 1>, scalar_prefetch = 0 : i64, scratch_operands = 0 : i64, tpu.core_type = #tpu.core_type<tc>, window_params = [{transform_indices = @transform_0, window_bounds = array<i64: 8, 32>}, {pipeline_mode = #tpu.pipeline_mode<synchronous>, transform_indices = @transform_1, window_bounds = array<i64: 32, 128>}, {pipeline_mode = #tpu.pipeline_mode<synchronous>, transform_indices = @transform_2, window_bounds = array<i64: 1, 128>}, {transform_indices = @transform_3, window_bounds = array<i64: 8, 16>}]} {
    %c0 = arith.constant 0 : index
    %c0_0 = arith.constant 0 : index
    %0 = vector.load %arg1[%c0, %c0_0] : memref<8x32xf32, #tpu.memory_space<vmem>>, vector<8x32xf32>
    %1 = arith.truncf %0 : vector<8x32xf32> to vector<8x32xbf16>
    %c0_1 = arith.constant 0 : index
    %c0_2 = arith.constant 0 : index
    %2 = vector.load %arg2[%c0_1, %c0_2] : memref<32x128xbf16, #tpu.memory_space<vmem>>, vector<32x128xbf16>
    %cst = arith.constant dense<0.000000e+00> : vector<8x128xf32>
    %3 = tpu.matmul %1, %2, %cst {dimension_numbers = #tpu.dot_dimension_numbers<[1], [0], [0], [1], [0, 0, 1, 1], [], []>} : vector<8x32xbf16>, vector<32x128xbf16>, vector<8x128xf32> -> vector<8x128xf32>
    %c0_3 = arith.constant 0 : index
    %c0_4 = arith.constant 0 : index
    %4 = vector.load %arg3[%c0_3, %c0_4] : memref<1x128xf32, #tpu.memory_space<vmem>>, vector<1x128xf32>
    %5 = vector.broadcast %4 : vector<1x128xf32> to vector<8x128xf32>
    %6 = arith.addf %3, %5 : vector<8x128xf32>
    %cst_5 = arith.constant dense<0xFF800000> : vector<8xf32>
    %7 = vector.multi_reduction <maximumf>, %6, %cst_5 [1] : vector<8x128xf32> to vector<8xf32>
    %8 = vector.shape_cast %7 : vector<8xf32> to vector<8x1xf32>
    %9 = vector.broadcast %8 : vector<8x1xf32> to vector<8x128xf32>
    %10 = arith.subf %6, %9 : vector<8x128xf32>
    %11 = math.exp %10 : vector<8x128xf32>
    %cst_6 = arith.constant dense<0.000000e+00> : vector<8xf32>
    %12 = vector.multi_reduction <add>, %11, %cst_6 [1] : vector<8x128xf32> to vector<8xf32>
    %13 = vector.shape_cast %12 : vector<8xf32> to vector<8x1xf32>
    %14 = math.log %13 : vector<8x1xf32>
    %15 = vector.broadcast %14 : vector<8x1xf32> to vector<8x128xf32>
    %16 = arith.subf %10, %15 : vector<8x128xf32>
    %17 = vector.extract_strided_slice %16 {offsets = [0, 0], sizes = [8, 16], strides = [1, 1]} : vector<8x128xf32> to vector<8x16xf32>
    %c0_7 = arith.constant 0 : index
    %c0_8 = arith.constant 0 : index
    %18 = vector.load %arg4[%c0_7, %c0_8] : memref<8x16xf32, #tpu.memory_space<vmem>>, vector<8x16xf32>
    tpu.vector_store %arg4[%c0_7, %c0_8], %17 {strides = array<i32>} : memref<8x16xf32, #tpu.memory_space<vmem>>, vector<8x16xf32>,
    return
  }
  func.func @transform_0(%arg0: i32) -> (i32, i32) {
    %c0_i32 = arith.constant 0 : i32
    %c0_i32_0 = arith.constant 0 : i32
    return %arg0, %c0_i32 : i32, i32
  }
  func.func @transform_1(%arg0: i32) -> (i32, i32) {
    %c0_i32 = arith.constant 0 : i32
    %c0_i32_0 = arith.constant 0 : i32
    %c0_i32_1 = arith.constant 0 : i32
    return %c0_i32, %c0_i32_0 : i32, i32
  }
  func.func @transform_2(%arg0: i32) -> (i32, i32) {
    %c0_i32 = arith.constant 0 : i32
    %c0_i32_0 = arith.constant 0 : i32
    %c0_i32_1 = arith.constant 0 : i32
    return %c0_i32, %c0_i32_0 : i32, i32
  }
  func.func @transform_3(%arg0: i32) -> (i32, i32) {
    %c0_i32 = arith.constant 0 : i32
    %c0_i32_0 = arith.constant 0 : i32
    return %arg0, %c0_i32 : i32, i32
  }
}

</mosaic_0001>

<bundles_post_ra>
// kernel: tpu_custom_call.1
= control target key start
LH: loop header
LB: loop body
LE: loop exit
PB: predicated region body
PF: predicated region fallthrough
CT: control target
= control target key end

     0   :  { %8 = vsyncpa [#allocation3], 0  ;;  %s312_s0 = inlined_call_operand.hbm [shape: f32[8,32], index: 0, kind: input, shape index: {}]   ;;  %s313_s1 = inlined_call_operand.hbm [shape: bf16[32,128], index: 1, kind: input, shape index: {}]   ;;  %s314_s2 = inlined_call_operand.vmem [shape: f32[1,128], index: 2, kind: input, shape index: {}]   ;;  %s315_s3 = inlined_call_operand.hbm [shape: f32[8,16], index: 3, kind: output, shape index: {}]  }
   0x1   :  { %9 = vsyncpa [#allocation6], 0 }
   0x2   :  { %10 = vsyncpa [#allocation4], 0  ;;  %s239_s12 = smov [#allocation2]   ;;  %s240_s14 = smov [#allocation5]  }
   0x3   :  { %s17_s13 = sshll.u32 %s239_s12, 4  ;;  %s26_s15 = sshll.u32 %s240_s14, 4  ;;  %s18_s13 = int_to_ptr.vmem [resolvable:$true] %s17_s13  ;;  %s266_s15 = int_to_ptr.vmem [resolvable:$true] %s26_s15 }
   0x4   :  { %s167_s18 = scalar_lea.hbm %s312_s0, 128 }
   0x5   :  { %p168_p0 = scmp.ne.s32.totalorder %s312_s0, %s167_s18  ;;  %p171_p1 = scmp.lt.u32.totalorder %s167_s18, %s312_s0 }
   0x7   :  { %p173_p2 = pnand %p171_p1, %p168_p0 }
   0x9   :  { %176 = shalt.err (!%p173_p2)
}
   0xa   :  { %s177_s23 = scalar_lea.vmem %s18_s13, 128  ;;  %p182_p4 = scmp.lt.s32.totalorder %s18_s13, %s18_s13 }
   0xb   :  { %p178_p3 = scmp.ne.s32.totalorder %s18_s13, %s177_s23  ;;  %p183_p5 = scmp.lt.s32.totalorder %s177_s23, %s177_s23 }
   0xd   :  { %p184_p6 = por %p183_p5, %p182_p4 }
   0xf   :  { %p185_p7 = pnand %p184_p6, %p178_p3 }
  0x11   :  { %188 = shalt.err (!%p185_p7)
}
  0x12   :  { %20 = dma.hbm_to_vmem [thread:$0]  %s312_s0, 128, %s18_s13, [#allocation3]  }
  0x13   :  { %s189_s28 = scalar_lea.hbm %s313_s1, 256 }
  0x14   :  { %p190_p8 = scmp.ne.s32.totalorder %s313_s1, %s189_s28  ;;  %p193_p9 = scmp.lt.u32.totalorder %s189_s28, %s313_s1 }
  0x16   :  { %p195_p10 = pnand %p193_p9, %p190_p8 }
  0x18   :  { %198 = shalt.err (!%p195_p10)
}
  0x19   :  { %s199_s6 = scalar_lea.vmem %s266_s15, 256  ;;  %p204_p12 = scmp.lt.s32.totalorder %s266_s15, %s266_s15 }
  0x1a   :  { %p200_p11 = scmp.ne.s32.totalorder %s266_s15, %s199_s6  ;;  %p205_p13 = scmp.lt.s32.totalorder %s199_s6, %s199_s6 }
  0x1c   :  { %p206_p0 = por %p205_p13, %p204_p12 }
  0x1e   :  { %p207_p1 = pnand %p206_p0, %p200_p11 }
  0x20   :  { %210 = shalt.err (!%p207_p1)
}
  0x21   :  { %s241_s0 = smov 64   ;;  %s242_s7 = smov 4  }
  0x22   :  { %32 = dma.hbm_to_vmem [thread:$0]  %s313_s1, 256, %s266_s15, [#allocation6], %s241_s0, %s241_s0, %s242_s7  }
  0x23   :  { %233 = dma.done.wait [#allocation3], 128  }
  0x24   :  { %234 = vsyncadd [#allocation3], 4294967168 }
  0x25   :  { %235 = dma.done.wait [#allocation6], 256  }
  0x26   :  { %236 = vsyncadd [#allocation6], 4294967040  ;;  %v243_v0 = vmov 0.0   ;;  %vm244_vm0 = vmmov 0   ;;  %v161_v1 = vld [vmem:[#allocation5] sm:$0xff]   ;;  %v162_v2 = vld [vmem:[#allocation5 + $0x8] sm:$0xff]  }
  0x27   :  { %146 = vmatprep.subr.bf16.mxu0 %v243_v0  ;;  %150 = vmatprep.mubr.msk.bf16.mxu0 %vm244_vm0, %v243_v0  ;;  %v42_v3 = vld [vmem:[#allocation2] sm:$0xff]  ;;  %vm67_vm1 = vcmask 261120   ;;  %s245_s1 = smov [#allocation7]   ;;  %vm121_vm2 = vcmask 130048  }
  0x28   :  { %147 = vmatpush3.bf16.msra.mxu0 %v161_v1  ;;  %v43_v4 = vpack.c.bf16 %v42_v3, %v42_v3  ;;  %v139_v5 = vld [vmem:[%s314_s2] ss:$0 sm:$0xff]  ;;  %s129_s12 = sshll.u32 %s245_s1, 4  ;;  %s130_s12 = int_to_ptr.vmem [resolvable:$true] %s129_s12 }
  0x29   :  { %148 = vmatprep.subr.bf16.mxu0 %v243_v0  ;;  %s211_s2 = scalar_lea.vmem %s130_s12, 128  ;;  %p216_p3 = scmp.lt.s32.totalorder %s130_s12, %s130_s12 }
  0x2a   :  { %p212_p2 = scmp.ne.s32.totalorder %s130_s12, %s211_s2  ;;  %p217_p4 = scmp.lt.s32.totalorder %s211_s2, %s211_s2 }
  0x2c   :  { %149 = vmatpush3.bf16.msra.mxu0 %v162_v2  ;;  %p218_p5 = por %p217_p4, %p216_p3 }
  0x2e   :  { %p219_p6 = pnand %p218_p5, %p212_p2 }
  0x2f   :  { %151 = vmatmul.mubr.msk.bf16.vlgmr.msra.gmra.mrb[0].mxu0 %vm67_vm1, %v43_v4 }
 0x102   :  { %v105_v6 = vpop.f32.mrb[0].mxu0 }
 0x103   :  { %v106_v7 = vadd.f32 %v139_v5, %v105_v6  ;;  %v152_v8 = vpop.f32.mrb[1].mxu0 }
 0x104   :  { %v108_v9 = vpop.f32.mrb[2].mxu0 }
 0x105   :  { %111 = vmax.xlane.f32.xlu0 %v106_v7  ;;  %v153_v10 = vpop.f32.mrb[3].mxu0 }
 0x192   :  { %v112_v11 = vpop.xlane.xlu0 %111 }
 0x193   :  { %v113_v12 = vsub.f32 %v106_v7, %v112_v11 }
 0x195   :  { %v114_v13 = vmul.f32 1.442695, %v113_v12 }
 0x197   :  { %163 = vpow2.f32 %v114_v13 }
 0x1a1   :  { %v164_v14 = vpop.eup %163 }
 0x1a2   :  { %116 = vadd.xlane.f32.xlu0 %v164_v14 }
 0x22f   :  { %v117_v15 = vpop.xlane.xlu0 %116 }
 0x230   :  { %165 = vlog2.f32 %v117_v15 }
 0x23a   :  { %v166_v16 = vpop.eup %165 }
 0x23b   :  { %v119_v17 = vmul.f32 0.6931472, %v166_v16 }
 0x23d   :  { %v120_v18 = vsub.f32 %v113_v12, %v119_v17 }
 0x23f   :  { %122 = vst.msk [vmem:[#allocation7] sm:$0xff] %vm121_vm2, %v120_v18 }
 0x240   :  { %222 = shalt.err (!%p219_p6)
}
 0x241   :  { %s223_s15 = scalar_lea.hbm %s315_s3, 128 }
 0x242   :  { %p224_p7 = scmp.ne.s32.totalorder %s315_s3, %s223_s15  ;;  %p227_p8 = scmp.lt.u32.totalorder %s223_s15, %s315_s3 }
 0x244   :  { %p229_p9 = pnand %p227_p8, %p224_p7 }
 0x246   :  { %232 = shalt.err (!%p229_p9)
}
 0x247   :  { %132 = dma.vmem_to_hbm [thread:$0]  %s130_s12, 128, %s315_s3, [#allocation4]  }
 0x248   :  { %237 = dma.done.wait [#allocation4], 128  }
 0x249   :  { %238 = vsyncadd [#allocation4], 4294967168 }
 0x24a   :  { %136 = vsyncpa [#allocation3], 1 }
 0x24b   :  { %137 = vsyncpa [#allocation6], 1 }
 0x24c   :  { %138 = vsyncpa [#allocation4], 1 }

</bundles_post_ra>
